<compile_context>
chip_gen: v7x
topology: tpu7x:2x2x1
jax: 0.10.0
libtpu: 0.0.40
codegen_flags: <defaults>
</compile_context>

<pallas_src>
import numpy as np
import jax
import jax.numpy as jnp
from jax.experimental import pallas as pl
from jax.experimental.pallas import tpu as pltpu

_LANE = 128
_SUBLANE = 8


def _round_up(v, m):
    return (v + m - 1) // m * m


def _pick_batch_tiling(batch):
    """Pick (batch_tile, padded_batch) for the fused-heads kernel."""
    bp8 = _round_up(batch, _SUBLANE)
    if bp8 <= 2 * _SUBLANE:
        tb = bp8                                    # tiny batch: single slab, no grid overhead
    elif bp8 <= 1024:
        tb = _round_up(pl.cdiv(bp8, 2), _SUBLANE)   # >=2 grid steps: both v7x TCs get work
    else:
        tb = 512                                    # large batch: ~85% HBM-roofline tile size
    return tb, _round_up(batch, tb)


def _joint_heads_kernel(xt_ref, wt_ref, bt_ref, xr_ref, wr_ref, br_ref, ot_ref, or_ref):
    # xt_ref: (TB, 768)   technical features tile           (VMEM)
    # wt_ref: (768, 128)  collapsed W_eff_T, lanes 1..127 zero
    # bt_ref: (1, 128)    collapsed b_eff_T, lanes 1..127 zero
    # xr_ref: (TB, 1000)  rationality features tile (full-extent last dim)
    # wr_ref: (1000, 128) collapsed W_eff_R
    # br_ref: (1, 128)    collapsed b_eff_R
    # ot_ref/or_ref: (TB, 128) lane-dense output slabs (column 0 holds the real scalar)
    ot_ref[...] = (
        jnp.dot(xt_ref[...], wt_ref[...], preferred_element_type=jnp.float32) + bt_ref[...]
    ).astype(ot_ref.dtype)
    or_ref[...] = (
        jnp.dot(xr_ref[...], wr_ref[...], preferred_element_type=jnp.float32) + br_ref[...]
    ).astype(or_ref.dtype)


def prepare_joint_head_params(params):
    """One-time (load-time) preprocessing of the quality-regression heads.

    For each head (torch nn.Linear layout: w1 (H, Din), b1 (H,), w2 (Dout, H), b2 (Dout,)):
      y = (x @ W1.T + b1) @ W2.T + b2  ==  x @ W_eff + b_eff      (exact: no activation between)
    W_eff / b_eff are padded to a lane-dense 128-wide slab for unmasked stores in the kernel.
    """
    prepared = {}
    hi = jax.lax.Precision.HIGHEST
    for name, (w1, b1, w2, b2) in params.items():
        w1 = jnp.asarray(w1, jnp.float32)
        b1 = jnp.asarray(b1, jnp.float32)
        w2 = jnp.asarray(w2, jnp.float32)
        b2 = jnp.asarray(b2, jnp.float32)
        dout = w2.shape[0]
        out_p = _round_up(max(dout, _LANE), _LANE)
        w_eff = jnp.matmul(w1.T, w2.T, precision=hi)                       # (Din, Dout)
        b_eff = jnp.matmul(b1[None, :], w2.T, precision=hi) + b2[None, :]  # (1, Dout)
        w_eff = jnp.pad(w_eff, ((0, 0), (0, out_p - dout)))                # (Din, 128)
        b_eff = jnp.pad(b_eff, ((0, 0), (0, out_p - dout)))                # (1, 128)
        prepared[name] = {"w": w_eff, "b": b_eff, "dout": dout}
    return prepared


def _joint_heads(feats_t, feats_r, w_t, b_t, w_r, b_r):
    """Single fused pallas_call computing both quality heads."""
    B = feats_t.shape[0]
    assert feats_r.shape[0] == B
    DT = feats_t.shape[1]
    DR = feats_r.shape[1]
    OUT_P = w_t.shape[1]
    f32 = jnp.float32

    feats_t = feats_t.astype(f32)
    feats_r = feats_r.astype(f32)
    TB, Bp = _pick_batch_tiling(B)
    if Bp != B:  # only batch rows are padded; feature dims go in at full extent
        feats_t = jnp.pad(feats_t, ((0, Bp - B), (0, 0)))
        feats_r = jnp.pad(feats_r, ((0, Bp - B), (0, 0)))

    out_t, out_r = pl.pallas_call(
        _joint_heads_kernel,
        out_shape=(
            jax.ShapeDtypeStruct((Bp, OUT_P), f32),
            jax.ShapeDtypeStruct((Bp, OUT_P), f32),
        ),
        grid=(Bp // TB,),
        in_specs=[
            pl.BlockSpec((TB, DT), lambda i: (i, 0)),      # technical feats, batch-tiled
            pl.BlockSpec((DT, OUT_P), lambda i: (0, 0)),   # resident collapsed weights
            pl.BlockSpec((1, OUT_P), lambda i: (0, 0)),
            pl.BlockSpec((TB, DR), lambda i: (i, 0)),      # rationality feats (full-extent 1000)
            pl.BlockSpec((DR, OUT_P), lambda i: (0, 0)),
            pl.BlockSpec((1, OUT_P), lambda i: (0, 0)),
        ],
        out_specs=(
            pl.BlockSpec((TB, OUT_P), lambda i: (i, 0)),
            pl.BlockSpec((TB, OUT_P), lambda i: (i, 0)),
        ),
        compiler_params=pltpu.CompilerParams(
            dimension_semantics=("parallel",),
            vmem_limit_bytes=32 * 1024 * 1024,
        ),
    )(feats_t, w_t, b_t, feats_r, w_r, b_r)
    return out_t[:B], out_r[:B]


def joint_model_forward(feats_technical, feats_rationality, prepared):
    """JOINT_Model.forward head computation.

    TODO(synk): technical/rationality feature extraction (pretrained Swin-T / ResNet-50) is not
    re-implemented; inputs are the backbone output feature vectors (B, 768) / (B, 1000).
    """
    pT = prepared["quality_T"]
    pR = prepared["quality_R"]
    out_t, out_r = _joint_heads(feats_technical, feats_rationality,
                                pT["w"], pT["b"], pR["w"], pR["b"])
    return out_t[:, : pT["dout"]], out_r[:, : pR["dout"]]


def _init_linear(key, out_features, in_features):
    # Mimic torch nn.Linear default init: U(-1/sqrt(fan_in), 1/sqrt(fan_in)).
    kw, kb = jax.random.split(key)
    bound = 1.0 / np.sqrt(in_features)
    w = jax.random.uniform(kw, (out_features, in_features), jnp.float32, -bound, bound)
    b = jax.random.uniform(kb, (out_features,), jnp.float32, -bound, bound)
    return w, b


if __name__ == "__main__":
    key = jax.random.PRNGKey(0)
    B = 2
    IN_T, IN_R, HID, OUT = 768, 1000, 128, 1   # dims implied by the module

    k_feat_t, k_feat_r, k_t1, k_t2, k_r1, k_r2 = jax.random.split(key, 6)
    feats_T = jax.random.normal(k_feat_t, (B, IN_T), dtype=jnp.float32)
    feats_R = jax.random.normal(k_feat_r, (B, IN_R), dtype=jnp.float32)

    w1_T, b1_T = _init_linear(k_t1, HID, IN_T)
    w2_T, b2_T = _init_linear(k_t2, OUT, HID)
    w1_R, b1_R = _init_linear(k_r1, HID, IN_R)
    w2_R, b2_R = _init_linear(k_r2, OUT, HID)

    params = {
        "quality_T": (w1_T, b1_T, w2_T, b2_T),
        "quality_R": (w1_R, b1_R, w2_R, b2_R),
    }

    # Hoisted, one-time weight preprocessing (algebraic collapse + lane-dense padding).
    prepared = jax.block_until_ready(prepare_joint_head_params(params))

    fwd = jax.jit(lambda ft, fr: joint_model_forward(ft, fr, prepared))
    x_T, x_R = jax.block_until_ready(fwd(feats_T, feats_R))

    # Independent NumPy float64 reference of the ORIGINAL (non-collapsed) two-Linear head.
    def ref_head(x, w1, b1, w2, b2):
        x = np.asarray(x, np.float64)
        h = x @ np.asarray(w1, np.float64).T + np.asarray(b1, np.float64)
        return h @ np.asarray(w2, np.float64).T + np.asarray(b2, np.float64)

    ref_T = ref_head(feats_T, w1_T, b1_T, w2_T, b2_T)
    ref_R = ref_head(feats_R, w1_R, b1_R, w2_R, b2_R)

    assert x_T.shape == (B, OUT), x_T.shape
    assert x_R.shape == (B, OUT), x_R.shape
    # Tolerance accounts for f32 reassociation introduced by the exact algebraic collapse.
    np.testing.assert_allclose(np.asarray(x_T), ref_T, rtol=5e-3, atol=5e-3)
    np.testing.assert_allclose(np.asarray(x_R), ref_R, rtol=5e-3, atol=5e-3)
    print("KERNEL_OK")
</pallas_src>

<mosaic_0001>
module attributes {stable_mosaic.version = 11 : i64} {
  func.func @_joint_heads_kernel(%arg0: i32, %arg1: memref<8x768xf32, #tpu.memory_space<vmem>>, %arg2: memref<768x128xf32, #tpu.memory_space<vmem>>, %arg3: memref<1x128xf32, #tpu.memory_space<vmem>>, %arg4: memref<8x1000xf32, #tpu.memory_space<vmem>>, %arg5: memref<1000x128xf32, #tpu.memory_space<vmem>>, %arg6: memref<1x128xf32, #tpu.memory_space<vmem>>, %arg7: memref<8x128xf32, #tpu.memory_space<vmem>>, %arg8: memref<8x128xf32, #tpu.memory_space<vmem>>) attributes {dimension_semantics = [#tpu.dimension_semantics<parallel>], iteration_bounds = array<i64: 1>, scalar_prefetch = 0 : i64, scratch_operands = 0 : i64, tpu.core_type = #tpu.core_type<tc>, window_params = [{transform_indices = @transform_0, window_bounds = array<i64: 8, 768>}, {pipeline_mode = #tpu.pipeline_mode<synchronous>, transform_indices = @transform_1, window_bounds = array<i64: 768, 128>}, {pipeline_mode = #tpu.pipeline_mode<synchronous>, transform_indices = @transform_2, window_bounds = array<i64: 1, 128>}, {transform_indices = @transform_3, window_bounds = array<i64: 8, 1000>}, {pipeline_mode = #tpu.pipeline_mode<synchronous>, transform_indices = @transform_4, window_bounds = array<i64: 1000, 128>}, {pipeline_mode = #tpu.pipeline_mode<synchronous>, transform_indices = @transform_5, window_bounds = array<i64: 1, 128>}, {transform_indices = @transform_6, window_bounds = array<i64: 8, 128>}, {transform_indices = @transform_7, window_bounds = array<i64: 8, 128>}]} {
    %c0 = arith.constant 0 : index
    %c0_0 = arith.constant 0 : index
    %0 = vector.load %arg1[%c0, %c0_0] : memref<8x768xf32, #tpu.memory_space<vmem>>, vector<8x768xf32>
    %c0_1 = arith.constant 0 : index
    %c0_2 = arith.constant 0 : index
    %1 = vector.load %arg2[%c0_1, %c0_2] : memref<768x128xf32, #tpu.memory_space<vmem>>, vector<768x128xf32>
    %cst = arith.constant dense<0.000000e+00> : vector<8x128xf32>
    %2 = tpu.matmul %0, %1, %cst {dimension_numbers = #tpu.dot_dimension_numbers<[1], [0], [0], [1], [0, 0, 1, 1], [], []>} : vector<8x768xf32>, vector<768x128xf32>, vector<8x128xf32> -> vector<8x128xf32>
    %c0_3 = arith.constant 0 : index
    %c0_4 = arith.constant 0 : index
    %3 = vector.load %arg3[%c0_3, %c0_4] : memref<1x128xf32, #tpu.memory_space<vmem>>, vector<1x128xf32>
    %4 = vector.broadcast %3 : vector<1x128xf32> to vector<8x128xf32>
    %5 = arith.addf %2, %4 : vector<8x128xf32>
    %c0_5 = arith.constant 0 : index
    %c0_6 = arith.constant 0 : index
    %6 = vector.load %arg7[%c0_5, %c0_6] : memref<8x128xf32, #tpu.memory_space<vmem>>, vector<8x128xf32>
    tpu.vector_store %arg7[%c0_5, %c0_6], %5 {strides = array<i32>} : memref<8x128xf32, #tpu.memory_space<vmem>>, vector<8x128xf32>,
    %c0_7 = arith.constant 0 : index
    %c0_8 = arith.constant 0 : index
    %7 = vector.load %arg4[%c0_7, %c0_8] : memref<8x1000xf32, #tpu.memory_space<vmem>>, vector<8x1000xf32>
    %c0_9 = arith.constant 0 : index
    %c0_10 = arith.constant 0 : index
    %8 = vector.load %arg5[%c0_9, %c0_10] : memref<1000x128xf32, #tpu.memory_space<vmem>>, vector<1000x128xf32>
    %cst_11 = arith.constant dense<0.000000e+00> : vector<8x128xf32>
    %9 = tpu.matmul %7, %8, %cst_11 {dimension_numbers = #tpu.dot_dimension_numbers<[1], [0], [0], [1], [0, 0, 1, 1], [], []>} : vector<8x1000xf32>, vector<1000x128xf32>, vector<8x128xf32> -> vector<8x128xf32>
    %c0_12 = arith.constant 0 : index
    %c0_13 = arith.constant 0 : index
    %10 = vector.load %arg6[%c0_12, %c0_13] : memref<1x128xf32, #tpu.memory_space<vmem>>, vector<1x128xf32>
    %11 = vector.broadcast %10 : vector<1x128xf32> to vector<8x128xf32>
    %12 = arith.addf %9, %11 : vector<8x128xf32>
    %c0_14 = arith.constant 0 : index
    %c0_15 = arith.constant 0 : index
    %13 = vector.load %arg8[%c0_14, %c0_15] : memref<8x128xf32, #tpu.memory_space<vmem>>, vector<8x128xf32>
    tpu.vector_store %arg8[%c0_14, %c0_15], %12 {strides = array<i32>} : memref<8x128xf32, #tpu.memory_space<vmem>>, vector<8x128xf32>,
    return
  }
  func.func @transform_0(%arg0: i32) -> (i32, i32) {
    %c0_i32 = arith.constant 0 : i32
    %c0_i32_0 = arith.constant 0 : i32
    return %arg0, %c0_i32 : i32, i32
  }
  func.func @transform_1(%arg0: i32) -> (i32, i32) {
    %c0_i32 = arith.constant 0 : i32
    %c0_i32_0 = arith.constant 0 : i32
    %c0_i32_1 = arith.constant 0 : i32
    return %c0_i32, %c0_i32_0 : i32, i32
  }
  func.func @transform_2(%arg0: i32) -> (i32, i32) {
    %c0_i32 = arith.constant 0 : i32
    %c0_i32_0 = arith.constant 0 : i32
    %c0_i32_1 = arith.constant 0 : i32
    return %c0_i32, %c0_i32_0 : i32, i32
  }
  func.func @transform_3(%arg0: i32) -> (i32, i32) {
    %c0_i32 = arith.constant 0 : i32
    %c0_i32_0 = arith.constant 0 : i32
    return %arg0, %c0_i32 : i32, i32
  }
  func.func @transform_4(%arg0: i32) -> (i32, i32) {
    %c0_i32 = arith.constant 0 : i32
    %c0_i32_0 = arith.constant 0 : i32
    %c0_i32_1 = arith.constant 0 : i32
    return %c0_i32, %c0_i32_0 : i32, i32
  }
  func.func @transform_5(%arg0: i32) -> (i32, i32) {
    %c0_i32 = arith.constant 0 : i32
    %c0_i32_0 = arith.constant 0 : i32
    %c0_i32_1 = arith.constant 0 : i32
    return %c0_i32, %c0_i32_0 : i32, i32
  }
  func.func @transform_6(%arg0: i32) -> (i32, i32) {
    %c0_i32 = arith.constant 0 : i32
    %c0_i32_0 = arith.constant 0 : i32
    return %arg0, %c0_i32 : i32, i32
  }
  func.func @transform_7(%arg0: i32) -> (i32, i32) {
    %c0_i32 = arith.constant 0 : i32
    %c0_i32_0 = arith.constant 0 : i32
    return %arg0, %c0_i32 : i32, i32
  }
}

</mosaic_0001>

<bundles_post_ra>
// kernel: _lambda_.1
= control target key start
LH: loop header
LB: loop body
LE: loop exit
PB: predicated region body
PF: predicated region fallthrough
CT: control target
= control target key end

     0   :  { %13 = vsyncpa [#allocation3], 0  ;;  %s1447_s0 = inlined_call_operand.vmem [shape: f32[8,768], index: 0, kind: input, shape index: {}]   ;;  %s1448_s1 = inlined_call_operand.hbm [shape: f32[768,128], index: 1, kind: input, shape index: {}]   ;;  %s1449_s2 = inlined_call_operand.vmem [shape: f32[1,128], index: 2, kind: input, shape index: {}]   ;;  %s1450_s3 = inlined_call_operand.vmem [shape: f32[8,1000], index: 3, kind: input, shape index: {}]   ;;  %s1451_s4 = inlined_call_operand.hbm [shape: f32[1000,128], index: 4, kind: input, shape index: {}]   ;;  %s1452_s5 = inlined_call_operand.vmem [shape: f32[1,128], index: 5, kind: input, shape index: {}]   ;;  %s1453_s6 = inlined_call_operand.vmem [shape: f32[8,128], index: 6, kind: output, shape index: {0}]   ;;  %s1454_s7 = inlined_call_operand.vmem [shape: f32[8,128], index: 7, kind: output, shape index: {1}]  }
   0x1   :  { %14 = vsyncpa [#allocation5], 0  ;;  %s1309_s24 = smov [#allocation2]   ;;  %s1261_s28 = scalar_lea.hbm %s1448_s1, 12288 }
   0x2   :  { %s22_s25 = sshll.u32 %s1309_s24, 4  ;;  %p1262_p0 = scmp.ne.s32.totalorder %s1448_s1, %s1261_s28  ;;  %s23_s25 = int_to_ptr.vmem [resolvable:$true] %s22_s25 }
   0x3   :  { %p1265_p1 = scmp.lt.u32.totalorder %s1261_s28, %s1448_s1 }
   0x5   :  { %p1267_p2 = pnand %p1265_p1, %p1262_p0 }
   0x7   :  { %1270 = shalt.err (!%p1267_p2)
}
   0x8   :  { %s1271_s10 = scalar_lea.vmem %s23_s25, 12288  ;;  %p1276_p4 = scmp.lt.s32.totalorder %s23_s25, %s23_s25 }
   0x9   :  { %p1272_p3 = scmp.ne.s32.totalorder %s23_s25, %s1271_s10  ;;  %p1277_p5 = scmp.lt.s32.totalorder %s1271_s10, %s1271_s10 }
   0xb   :  { %p1278_p6 = por %p1277_p5, %p1276_p4 }
   0xd   :  { %p1279_p7 = pnand %p1278_p6, %p1272_p3 }
   0xf   :  { %1282 = shalt.err (!%p1279_p7)
}
  0x10   :  { %s1310_s11 = smov 128   ;;  %s1311_s12 = smov 8  }
  0x11   :  { %28 = dma.hbm_to_vmem [thread:$0]  %s1448_s1, 12288, %s23_s25, [#allocation3], %s1310_s11, %s1310_s11, %s1311_s12  }
  0x12   :  { %s1312_s15 = smov [#allocation4]   ;;  %s1283_s19 = scalar_lea.hbm %s1451_s4, 16000 }
  0x13   :  { %s38_s16 = sshll.u32 %s1312_s15, 4  ;;  %p1284_p8 = scmp.ne.s32.totalorder %s1451_s4, %s1283_s19  ;;  %s39_s16 = int_to_ptr.vmem [resolvable:$true] %s38_s16 }
  0x14   :  { %p1287_p9 = scmp.lt.u32.totalorder %s1283_s19, %s1451_s4 }
  0x16   :  { %p1289_p10 = pnand %p1287_p9, %p1284_p8 }
  0x18   :  { %1292 = shalt.err (!%p1289_p10)
}
  0x19   :  { %s1293_s24 = scalar_lea.vmem %s39_s16, 16000  ;;  %p1298_p12 = scmp.lt.s32.totalorder %s39_s16, %s39_s16 }
  0x1a   :  { %p1294_p11 = scmp.ne.s32.totalorder %s39_s16, %s1293_s24  ;;  %p1299_p13 = scmp.lt.s32.totalorder %s1293_s24, %s1293_s24 }
  0x1c   :  { %p1300_p0 = por %p1299_p13, %p1298_p12 }
  0x1e   :  { %p1301_p1 = pnand %p1300_p0, %p1294_p11 }
  0x20   :  { %1304 = shalt.err (!%p1301_p1)
}
  0x21   :  { %44 = dma.hbm_to_vmem [thread:$0]  %s1451_s4, 16000, %s39_s16, [#allocation5], %s1310_s11, %s1310_s11, %s1311_s12  }
  0x22   :  { %1305 = dma.done.wait [#allocation3], 12288  }
  0x23   :  { %1306 = vsyncadd [#allocation3], 4294955008 }
  0x24   :  { %1307 = dma.done.wait [#allocation5], 16000  }
  0x25   :  { %1308 = vsyncadd [#allocation5], 4294951296  ;;  %v75_v0 = vld [vmem:[#allocation2 + $0x80] sm:$0xff]  ;;  %v76_v1 = vld [vmem:[#allocation2 + $0x88] sm:$0xff]  ;;  %vm513_vm0 = vcmask 850944  }
  0x26   :  { %v59_v2 = vld [vmem:[#allocation2] sm:$0xff]  ;;  %v1021_v3 = vpack.c.bf16 %v76_v1, %v75_v0  ;;  %v60_v4 = vld [vmem:[#allocation2 + $0x8] sm:$0xff]  ;;  %v77_v5 = vld [vmem:[#allocation2 + $0x90] sm:$0xff] }
  0x27   :  { %v78_v6 = vld [vmem:[#allocation2 + $0x98] sm:$0xff]  ;;  %v1023_v7 = vpack.c.bf16 %v60_v4, %v59_v2  ;;  %v61_v9 = vld [vmem:[#allocation2 + $0x10] sm:$0xff]  ;;  %v79_v11 = vld [vmem:[#allocation2 + $0xa0] sm:$0xff] }
  0x28   :  { %v1025_v8 = vpack.c.bf16 %v78_v6, %v77_v5  ;;  %v62_v10 = vld [vmem:[#allocation2 + $0x18] sm:$0xff]  ;;  %1022 = vmatprep.subr.bf16.mxu1 %v1021_v3  ;;  %v80_v12 = vld [vmem:[#allocation2 + $0xa8] sm:$0xff]  ;;  %v139_v14 = vld [vmem:[#allocation2 + $0x280] sm:$0xff] }
  0x29   :  { %1024 = vmatpush3.bf16.msra.mxu1 %v1023_v7  ;;  %v1027_v13 = vpack.c.bf16 %v62_v10, %v61_v9  ;;  %v140_v15 = vld [vmem:[#allocation2 + $0x288] sm:$0xff]  ;;  %v123_v16 = vld [vmem:[#allocation2 + $0x200] sm:$0xff]  ;;  %v1029_v17 = vpack.c.bf16 %v80_v12, %v79_v11  ;;  %v81_v23 = vld [vmem:[#allocation2 + $0xb0] sm:$0xff] }
  0x2a   :  { %1026 = vmatprep.subr.bf16.mxu1 %v1025_v8  ;;  %v63_v18 = vld [vmem:[#allocation2 + $0x20] sm:$0xff]  ;;  %v64_v19 = vld [vmem:[#allocation2 + $0x28] sm:$0xff]  ;;  %v1085_v20 = vpack.c.bf16 %v140_v15, %v139_v14  ;;  %v82_v24 = vld [vmem:[#allocation2 + $0xb8] sm:$0xff] }
  0x2b   :  { %v124_v21 = vld [vmem:[#allocation2 + $0x208] sm:$0xff]  ;;  %v141_v25 = vld [vmem:[#allocation2 + $0x290] sm:$0xff]  ;;  %v142_v26 = vld [vmem:[#allocation2 + $0x298] sm:$0xff]  ;;  %v1031_v29 = vpack.c.bf16 %v64_v19, %v63_v18  ;;  %v1033_v34 = vpack.c.bf16 %v82_v24, %v81_v23 }
  0x2c   :  { %v1087_v22 = vpack.c.bf16 %v124_v21, %v123_v16  ;;  %1086 = vmatprep.subr.bf16.mxu0 %v1085_v20  ;;  %v125_v27 = vld [vmem:[#allocation2 + $0x210] sm:$0xff]  ;;  %v126_v28 = vld [vmem:[#allocation2 + $0x218] sm:$0xff]  ;;  %v1089_v32 = vpack.c.bf16 %v142_v26, %v141_v25  ;;  %v83_v35 = vld [vmem:[#allocation2 + $0xc0] sm:$0xff] }
  0x2d   :  { %1028 = vmatpush3.bf16.msra.mxu1 %v1027_v13  ;;  %v65_v30 = vld [vmem:[#allocation2 + $0x30] sm:$0xff]  ;;  %v66_v31 = vld [vmem:[#allocation2 + $0x38] sm:$0xff]  ;;  %v1091_v33 = vpack.c.bf16 %v126_v28, %v125_v27  ;;  %v143_v36 = vld [vmem:[#allocation2 + $0x2a0] sm:$0xff] }
  0x2e   :  { %1088 = vmatpush3.bf16.msra.mxu0 %v1087_v22  ;;  %1030 = vmatprep.subr.bf16.mxu1 %v1029_v17  ;;  %v144_v37 = vld [vmem:[#allocation2 + $0x2a8] sm:$0xff]  ;;  %v127_v40 = vld [vmem:[#allocation2 + $0x220] sm:$0xff]  ;;  %v1035_v42 = vpack.c.bf16 %v66_v31, %v65_v30  ;;  %v145_v45 = vld [vmem:[#allocation2 + $0x2b0] sm:$0xff] }
  0x2f   :  { %1090 = vmatprep.subr.bf16.mxu0 %v1089_v32  ;;  %v84_v38 = vld [vmem:[#allocation2 + $0xc8] sm:$0xff]  ;;  %v1093_v39 = vpack.c.bf16 %v144_v37, %v143_v36  ;;  %v67_v43 = vld [vmem:[#allocation2 + $0x40] sm:$0xff]  ;;  %v146_v46 = vld [vmem:[#allocation2 + $0x2b8] sm:$0xff] }
  0x30   :  { %v128_v41 = vld [vmem:[#allocation2 + $0x228] sm:$0xff]  ;;  %v1037_v47 = vpack.c.bf16 %v84_v38, %v83_v35  ;;  %v1097_v49 = vpack.c.bf16 %v146_v46, %v145_v45  ;;  %v129_v50 = vld [vmem:[#allocation2 + $0x230] sm:$0xff]  ;;  %v130_v51 = vld [vmem:[#allocation2 + $0x238] sm:$0xff] }
  0x31   :  { %1032 = vmatpush3.bf16.msra.mxu1 %v1031_v29  ;;  %v1095_v44 = vpack.c.bf16 %v128_v41, %v127_v40  ;;  %v68_v48 = vld [vmem:[#allocation2 + $0x48] sm:$0xff]  ;;  %v85_v52 = vld [vmem:[#allocation2 + $0xd0] sm:$0xff]  ;;  %v86_v53 = vld [vmem:[#allocation2 + $0xd8] sm:$0xff]  ;;  %v1099_v59 = vpack.c.bf16 %v130_v51, %v129_v50 }
  0x32   :  { %1092 = vmatpush3.bf16.msra.mxu0 %v1091_v33  ;;  %1034 = vmatprep.subr.bf16.mxu1 %v1033_v34  ;;  %v147_v54 = vld [vmem:[#allocation2 + $0x2c0] sm:$0xff]  ;;  %v148_v55 = vld [vmem:[#allocation2 + $0x2c8] sm:$0xff]  ;;  %v1039_v56 = vpack.c.bf16 %v68_v48, %v67_v43  ;;  %v69_v57 = vld [vmem:[#allocation2 + $0x50] sm:$0xff]  ;;  %v1041_v61 = vpack.c.bf16 %v86_v53, %v85_v52 }
  0x33   :  { %1094 = vmatprep.subr.bf16.mxu0 %v1093_v39  ;;  %v70_v58 = vld [vmem:[#allocation2 + $0x58] sm:$0xff]  ;;  %v87_v60 = vld [vmem:[#allocation2 + $0xe0] sm:$0xff]  ;;  %v88_v62 = vld [vmem:[#allocation2 + $0xe8] sm:$0xff]  ;;  %v1101_v63 = vpack.c.bf16 %v148_v55, %v147_v54 }
  0x34   :  { %v131_v0 = vld [vmem:[#allocation2 + $0x240] sm:$0xff]  ;;  %v132_v1 = vld [vmem:[#allocation2 + $0x248] sm:$0xff]  ;;  %v149_v2 = vld [vmem:[#allocation2 + $0x2d0] sm:$0xff]  ;;  %v1043_v5 = vpack.c.bf16 %v70_v58, %v69_v57  ;;  %v1045_v9 = vpack.c.bf16 %v88_v62, %v87_v60 }
  0x35   :  { %1036 = vmatpush3.bf16.msra.mxu1 %v1035_v42  ;;  %v150_v3 = vld [vmem:[#allocation2 + $0x2d8] sm:$0xff]  ;;  %v54_v4 = vld [vmem:[%s1447_s0 + $0x8] sm:$0xff]  ;;  %v71_v6 = vld [vmem:[#allocation2 + $0x60] sm:$0xff]  ;;  %v1103_v8 = vpack.c.bf16 %v132_v1, %v131_v0 }
  0x36   :  { %1096 = vmatpush3.bf16.msra.mxu0 %v1095_v44  ;;  %1038 = vmatprep.subr.bf16.mxu1 %v1037_v47  ;;  %v72_v7 = vld [vmem:[#allocation2 + $0x68] sm:$0xff]  ;;  %v89_v10 = vld [vmem:[#allocation2 + $0xf0] sm:$0xff]  ;;  %v1105_v11 = vpack.c.bf16 %v150_v3, %v149_v2  ;;  %v134_v13 = vld [vmem:[#allocation2 + $0x258] sm:$0xff] }
  0x37   :  { %1098 = vmatprep.subr.bf16.mxu0 %v1097_v49  ;;  %226 = vmatprep.mubr.f32.mxu1 %v54_v4  ;;  %v133_v12 = vld [vmem:[#allocation2 + $0x250] sm:$0xff]  ;;  %v90_v14 = vld [vmem:[#allocation2 + $0xf8] sm:$0xff]  ;;  %v151_v15 = vld [vmem:[#allocation2 + $0x2e0] sm:$0xff]  ;;  %v1047_v17 = vpack.c.bf16 %v72_v7, %v71_v6 }
  0x38   :  { %v152_v16 = vld [vmem:[#allocation2 + $0x2e8] sm:$0xff]  ;;  %v73_v18 = vld [vmem:[#allocation2 + $0x70] sm:$0xff]  ;;  %v74_v19 = vld [vmem:[#allocation2 + $0x78] sm:$0xff]  ;;  %v1107_v20 = vpack.c.bf16 %v134_v13, %v133_v12  ;;  %v1049_v22 = vpack.c.bf16 %v90_v14, %v89_v10 }
  0x39   :  { %1040 = vmatpush3.bf16.msra.mxu1 %v1039_v56  ;;  %v107_v21 = vld [vmem:[#allocation2 + $0x180] sm:$0xff]  ;;  %v108_v23 = vld [vmem:[#allocation2 + $0x188] sm:$0xff]  ;;  %v1109_v24 = vpack.c.bf16 %v152_v16, %v151_v15  ;;  %v153_v27 = vld [vmem:[#allocation2 + $0x2f0] sm:$0xff]  ;;  %v1051_v30 = vpack.c.bf16 %v74_v19, %v73_v18 }
  0x3a   :  { %1100 = vmatpush3.bf16.msra.mxu0 %v1099_v59  ;;  %1042 = vmatprep.subr.bf16.mxu1 %v1041_v61  ;;  %v135_v25 = vld [vmem:[#allocation2 + $0x260] sm:$0xff]  ;;  %v136_v26 = vld [vmem:[#allocation2 + $0x268] sm:$0xff]  ;;  %v154_v28 = vld [vmem:[#allocation2 + $0x2f8] sm:$0xff]  ;;  %v1053_v34 = vpack.c.bf16 %v108_v23, %v107_v21 }
  0x3b   :  { %1102 = vmatprep.subr.bf16.mxu0 %v1101_v63  ;;  %v58_v29 = vld [vmem:[%s1447_s0 + $0x28] sm:$0xff]  ;;  %v91_v31 = vld [vmem:[#allocation2 + $0x100] sm:$0xff]  ;;  %v1111_v33 = vpack.c.bf16 %v136_v26, %v135_v25  ;;  %v109_v35 = vld [vmem:[#allocation2 + $0x190] sm:$0xff]  ;;  %v1113_v36 = vpack.c.bf16 %v154_v28, %v153_v27 }
  0x3c   :  { %366 = vmatprep.mubr.f32.mxu0 %v58_v29  ;;  %v92_v32 = vld [vmem:[#allocation2 + $0x108] sm:$0xff]  ;;  %v137_v37 = vld [vmem:[#allocation2 + $0x270] sm:$0xff]  ;;  %v138_v38 = vld [vmem:[#allocation2 + $0x278] sm:$0xff] }
  0x3d   :  { %1044 = vmatpush3.bf16.msra.mxu1 %v1043_v5  ;;  %v110_v39 = vld [vmem:[#allocation2 + $0x198] sm:$0xff]  ;;  %v429_v40 = vld [vmem:[#allocation4 + $0x180] sm:$0xff]  ;;  %v430_v41 = vld [vmem:[#allocation4 + $0x188] sm:$0xff]  ;;  %v1055_v43 = vpack.c.bf16 %v92_v32, %v91_v31  ;;  %v1115_v46 = vpack.c.bf16 %v138_v38, %v137_v37 }
  0x3e   :  { %1104 = vmatpush3.bf16.msra.mxu0 %v1103_v8  ;;  %1046 = vmatprep.subr.bf16.mxu1 %v1045_v9  ;;  %v53_v42 = vld [vmem:[%s1447_s0] sm:$0xff]  ;;  %v93_v44 = vld [vmem:[#allocation2 + $0x110] sm:$0xff]  ;;  %v94_v45 = vld [vmem:[#allocation2 + $0x118] sm:$0xff]  ;;  %v1057_v47 = vpack.c.bf16 %v110_v39, %v109_v35  ;;  %v1149_v49 = vpack.c.bf16 %v430_v41, %v429_v40 }
  0x3f   :  { %1106 = vmatprep.subr.bf16.mxu0 %v1105_v11  ;;  %v111_v48 = vld [vmem:[#allocation2 + $0x1a0] sm:$0xff]  ;;  %v414_v51 = vld [vmem:[#allocation4 + $0x108] sm:$0xff]  ;;  %v431_v53 = vld [vmem:[#allocation4 + $0x190] sm:$0xff]  ;;  %v1059_v55 = vpack.c.bf16 %v94_v45, %v93_v44 }
  0x40   :  { %v413_v50 = vld [vmem:[#allocation4 + $0x100] sm:$0xff]  ;;  %v112_v52 = vld [vmem:[#allocation2 + $0x1a8] sm:$0xff]  ;;  %v432_v54 = vld [vmem:[#allocation4 + $0x198] sm:$0xff] }
  0x41   :  { %1048 = vmatpush3.bf16.msra.mxu1 %v1047_v17  ;;  %v95_v56 = vld [vmem:[#allocation2 + $0x120] sm:$0xff]  ;;  %v96_v57 = vld [vmem:[#allocation2 + $0x128] sm:$0xff]  ;;  %v1151_v59 = vpack.c.bf16 %v414_v51, %v413_v50  ;;  %v1061_v60 = vpack.c.bf16 %v112_v52, %v111_v48  ;;  %v113_v61 = vld [vmem:[#allocation2 + $0x1b0] sm:$0xff]  ;;  %v1153_v62 = vpack.c.bf16 %v432_v54, %v431_v53 }
  0x42   :  { %1108 = vmatpush3.bf16.msra.mxu0 %v1107_v20  ;;  %1050 = vmatprep.subr.bf16.mxu1 %v1049_v22  ;;  %v57_v58 = vld [vmem:[%s1447_s0 + $0x20] sm:$0xff]  ;;  %v415_v63 = vld [vmem:[#allocation4 + $0x110] sm:$0xff]  ;;  %v416_v0 = vld [vmem:[#allocation4 + $0x118] sm:$0xff]  ;;  %v1063_v4 = vpack.c.bf16 %v96_v57, %v95_v56 }
  0x43   :  { %1110 = vmatprep.subr.bf16.mxu0 %v1109_v24  ;;  %v114_v1 = vld [vmem:[#allocation2 + $0x1b8] sm:$0xff]  ;;  %v433_v2 = vld [vmem:[#allocation4 + $0x1a0] sm:$0xff]  ;;  %v434_v3 = vld [vmem:[#allocation4 + $0x1a8] sm:$0xff]  ;;  %v1155_v7 = vpack.c.bf16 %v416_v0, %v415_v63 }
  0x44   :  { %v97_v5 = vld [vmem:[#allocation2 + $0x130] sm:$0xff]  ;;  %v98_v6 = vld [vmem:[#allocation2 + $0x138] sm:$0xff]  ;;  %v1065_v9 = vpack.c.bf16 %v114_v1, %v113_v61  ;;  %v115_v10 = vld [vmem:[#allocation2 + $0x1c0] sm:$0xff]  ;;  %v1157_v11 = vpack.c.bf16 %v434_v3, %v433_v2 }
  0x45   :  { %1052 = vmatpush3.bf16.msra.mxu1 %v1051_v30  ;;  %v56_v8 = vld [vmem:[%s1447_s0 + $0x18] sm:$0xff]  ;;  %v417_v12 = vld [vmem:[#allocation4 + $0x120] sm:$0xff]  ;;  %v418_v13 = vld [vmem:[#allocation4 + $0x128] sm:$0xff]  ;;  %v1067_v17 = vpack.c.bf16 %v98_v6, %v97_v5 }
  0x46   :  { %1112 = vmatpush3.bf16.msra.mxu0 %v1111_v33  ;;  %1054 = vmatprep.subr.bf16.mxu1 %v1053_v34  ;;  %v116_v14 = vld [vmem:[#allocation2 + $0x1c8] sm:$0xff]  ;;  %v435_v15 = vld [vmem:[#allocation4 + $0x1b0] sm:$0xff]  ;;  %v436_v16 = vld [vmem:[#allocation4 + $0x1b8] sm:$0xff]  ;;  %v1159_v20 = vpack.c.bf16 %v418_v13, %v417_v12 }
  0x47   :  { %1114 = vmatprep.subr.bf16.mxu0 %v1113_v36  ;;  %v99_v18 = vld [vmem:[#allocation2 + $0x140] sm:$0xff]  ;;  %v100_v19 = vld [vmem:[#allocation2 + $0x148] sm:$0xff]  ;;  %v1069_v21 = vpack.c.bf16 %v116_v14, %v115_v10  ;;  %v117_v22 = vld [vmem:[#allocation2 + $0x1d0] sm:$0xff]  ;;  %v1161_v23 = vpack.c.bf16 %v436_v16, %v435_v15 }
  0x48   :  { %227 = vmatmul.mubr.f32.vlgmr.msra.gmra.mrb[0].mxu1 %v53_v42  ;;  %v419_v24 = vld [vmem:[#allocation4 + $0x130] sm:$0xff]  ;;  %v420_v25 = vld [vmem:[#allocation4 + $0x138] sm:$0xff]  ;;  %v437_v27 = vld [vmem:[#allocation4 + $0x1c0] sm:$0xff]  ;;  %v1071_v29 = vpack.c.bf16 %v100_v19, %v99_v18 }
  0x49   :  { %1056 = vmatpush3.bf16.msra.mxu1 %v1055_v43  ;;  %296 = vmatprep.mubr.f32.mxu1 %v56_v8  ;;  %v118_v26 = vld [vmem:[#allocation2 + $0x1d8] sm:$0xff]  ;;  %v438_v28 = vld [vmem:[#allocation4 + $0x1c8] sm:$0xff]  ;;  %v101_v30 = vld [vmem:[#allocation2 + $0x150] sm:$0xff]  ;;  %v1163_v32 = vpack.c.bf16 %v420_v25, %v419_v24 }
  0x4a   :  { %1116 = vmatpush3.bf16.msra.mxu0 %v1115_v46  ;;  %1058 = vmatprep.subr.bf16.mxu1 %v1057_v47  ;;  %v102_v31 = vld [vmem:[#allocation2 + $0x158] sm:$0xff]  ;;  %v1073_v34 = vpack.c.bf16 %v118_v26, %v117_v22  ;;  %v119_v35 = vld [vmem:[#allocation2 + $0x1e0] sm:$0xff]  ;;  %v1165_v36 = vpack.c.bf16 %v438_v28, %v437_v27  ;;  %v422_v38 = vld [vmem:[#allocation4 + $0x148] sm:$0xff] }
  0x4b   :  { %1150 = vmatprep.subr.bf16.mxu0 %v1149_v49  ;;  %v376_v33 = vld [vmem:[%s1450_s3 + $0x18] sm:$0xff]  ;;  %v421_v37 = vld [vmem:[#allocation4 + $0x140] sm:$0xff]  ;;  %v120_v39 = vld [vmem:[#allocation2 + $0x1e8] sm:$0xff]  ;;  %v1075_v42 = vpack.c.bf16 %v102_v31, %v101_v30 }
  0x4c   :  { %v439_v40 = vld [vmem:[#allocation4 + $0x1d0] sm:$0xff]  ;;  %v440_v41 = vld [vmem:[#allocation4 + $0x1d8] sm:$0xff]  ;;  %v103_v43 = vld [vmem:[#allocation2 + $0x160] sm:$0xff]  ;;  %v1167_v45 = vpack.c.bf16 %v422_v38, %v421_v37  ;;  %v1077_v46 = vpack.c.bf16 %v120_v39, %v119_v35 }
  0x4d   :  { %367 = vmatmul.mubr.f32.vlgmr.msra.gmra.mrb[0].mxu0 %v57_v58  ;;  %1060 = vmatpush3.bf16.msra.mxu1 %v1059_v55  ;;  %v104_v44 = vld [vmem:[#allocation2 + $0x168] sm:$0xff]  ;;  %v121_v47 = vld [vmem:[#allocation2 + $0x1f0] sm:$0xff]  ;;  %v1169_v48 = vpack.c.bf16 %v440_v41, %v439_v40  ;;  %v424_v50 = vld [vmem:[#allocation4 + $0x158] sm:$0xff] }
  0x4e   :  { %1152 = vmatpush3.bf16.msra.mxu0 %v1151_v59  ;;  %1062 = vmatprep.subr.bf16.mxu1 %v1061_v60  ;;  %v423_v49 = vld [vmem:[#allocation4 + $0x150] sm:$0xff]  ;;  %v122_v51 = vld [vmem:[#allocation2 + $0x1f8] sm:$0xff]  ;;  %v441_v52 = vld [vmem:[#allocation4 + $0x1e0] sm:$0xff]  ;;  %v1079_v54 = vpack.c.bf16 %v104_v44, %v103_v43 }
  0x4f   :  { %1154 = vmatprep.subr.bf16.mxu0 %v1153_v62  ;;  %651 = vmatprep.mubr.f32.mxu0 %v376_v33  ;;  %v442_v53 = vld [vmem:[#allocation4 + $0x1e8] sm:$0xff]  ;;  %v105_v55 = vld [vmem:[#allocation2 + $0x170] sm:$0xff]  ;;  %v106_v56 = vld [vmem:[#allocation2 + $0x178] sm:$0xff]  ;;  %v1171_v57 = vpack.c.bf16 %v424_v50, %v423_v49  ;;  %v1081_v58 = vpack.c.bf16 %v122_v51, %v121_v47 }
  0x50   :  { %v397_v59 = vld [vmem:[#allocation4 + $0x80] sm:$0xff]  ;;  %v1173_v60 = vpack.c.bf16 %v442_v53, %v441_v52  ;;  %v426_v62 = vld [vmem:[#allocation4 + $0x168] sm:$0xff]  ;;  %v443_v0 = vld [vmem:[#allocation4 + $0x1f0] sm:$0xff]  ;;  %v1083_v2 = vpack.c.bf16 %v106_v56, %v105_v55 }
  0x51   :  { %1064 = vmatpush3.bf16.msra.mxu1 %v1063_v4  ;;  %v425_v61 = vld [vmem:[#allocation4 + $0x160] sm:$0xff]  ;;  %v398_v63 = vld [vmem:[#allocation4 + $0x88] sm:$0xff]  ;;  %v444_v1 = vld [vmem:[#allocation4 + $0x1f8] sm:$0xff] }
  0x52   :  { %1156 = vmatpush3.bf16.msra.mxu0 %v1155_v7  ;;  %1066 = vmatprep.subr.bf16.mxu1 %v1065_v9  ;;  %v381_v3 = vld [vmem:[#allocation4] sm:$0xff]  ;;  %v1175_v4 = vpack.c.bf16 %v426_v62, %v425_v61  ;;  %v1117_v5 = vpack.c.bf16 %v398_v63, %v397_v59  ;;  %v382_v6 = vld [vmem:[#allocation4 + $0x8] sm:$0xff]  ;;  %v1177_v7 = vpack.c.bf16 %v444_v1, %v443_v0  ;;  %v427_v8 = vld [vmem:[#allocation4 + $0x170] sm:$0xff] }
  0x53   :  { %1158 = vmatprep.subr.bf16.mxu0 %v1157_v11  ;;  %v428_v9 = vld [vmem:[#allocation4 + $0x178] sm:$0xff]  ;;  %v399_v10 = vld [vmem:[#allocation4 + $0x90] sm:$0xff]  ;;  %v1119_v13 = vpack.c.bf16 %v382_v6, %v381_v3  ;;  %v477_v18 = vld [vmem:[#allocation4 + $0x300] sm:$0xff] }
  0x54   :  { %v400_v11 = vld [vmem:[#allocation4 + $0x98] sm:$0xff]  ;;  %v55_v12 = vld [vmem:[%s1447_s0 + $0x10] sm:$0xff]  ;;  %v1179_v15 = vpack.c.bf16 %v428_v9, %v427_v8  ;;  %v478_v19 = vld [vmem:[#allocation4 + $0x308] sm:$0xff] }
  0x55   :  { %1068 = vmatpush3.bf16.msra.mxu1 %v1067_v17  ;;  %v383_v14 = vld [vmem:[#allocation4 + $0x10] sm:$0xff]  ;;  %v1121_v16 = vpack.c.bf16 %v400_v11, %v399_v10  ;;  %v384_v17 = vld [vmem:[#allocation4 + $0x18] sm:$0xff]  ;;  %v374_v22 = vld [vmem:[%s1450_s3 + $0x8] sm:$0xff]  ;;  %v1214_v26 = vpack.c.bf16 %v478_v19, %v477_v18 }
  0x56   :  { %1160 = vmatpush3.bf16.msra.mxu0 %v1159_v20  ;;  %1070 = vmatprep.subr.bf16.mxu1 %v1069_v21  ;;  %v401_v20 = vld [vmem:[#allocation4 + $0xa0] sm:$0xff]  ;;  %v402_v21 = vld [vmem:[#allocation4 + $0xa8] sm:$0xff]  ;;  %v375_v25 = vld [vmem:[%s1450_s3 + $0x10] sm:$0xff] }
  0x57   :  { %1162 = vmatprep.subr.bf16.mxu0 %v1161_v23  ;;  %v1123_v23 = vpack.c.bf16 %v384_v17, %v383_v14  ;;  %v385_v24 = vld [vmem:[#allocation4 + $0x20] sm:$0xff]  ;;  %v1125_v27 = vpack.c.bf16 %v402_v21, %v401_v20  ;;  %v386_v28 = vld [vmem:[#allocation4 + $0x28] sm:$0xff]  ;;  %v479_v30 = vld [vmem:[#allocation4 + $0x310] sm:$0xff] }
  0x58   :  { %v480_v31 = vld [vmem:[#allocation4 + $0x318] sm:$0xff]  ;;  %v387_v35 = vld [vmem:[#allocation4 + $0x30] sm:$0xff]  ;;  %v481_v39 = vld [vmem:[#allocation4 + $0x320] sm:$0xff] }
  0x59   :  { %1072 = vmatpush3.bf16.msra.mxu1 %v1071_v29  ;;  %v1313_v29 = vmov 0.0|0.0   ;;  %v404_v33 = vld [vmem:[#allocation4 + $0xb8] sm:$0xff]  ;;  %v482_v40 = vld [vmem:[#allocation4 + $0x328] sm:$0xff]  ;;  %v405_v41 = vld [vmem:[#allocation4 + $0xc0] sm:$0xff] }
  0x5a   :  { %1164 = vmatpush3.bf16.msra.mxu0 %v1163_v32  ;;  %1074 = vmatprep.subr.bf16.mxu1 %v1073_v34  ;;  %v403_v32 = vld [vmem:[#allocation4 + $0xb0] sm:$0xff]  ;;  %v1127_v34 = vpack.c.bf16 %v386_v28, %v385_v24  ;;  %v388_v38 = vld [vmem:[#allocation4 + $0x38] sm:$0xff]  ;;  %v389_v44 = vld [vmem:[#allocation4 + $0x40] sm:$0xff] }
  0x5b   :  { %1166 = vmatprep.subr.bf16.mxu0 %v1165_v36  ;;  %v1217_v36 = vpack.c.bf16 %v480_v31, %v479_v30  ;;  %v1129_v37 = vpack.c.bf16 %v404_v33, %v403_v32  ;;  %v1131_v43 = vpack.c.bf16 %v388_v38, %v387_v35  ;;  %v484_v49 = vld [vmem:[#allocation4 + $0x338] sm:$0xff]  ;;  %v407_v51 = vld [vmem:[#allocation4 + $0xd0] sm:$0xff]  ;;  %v486_v59 = vld [vmem:[#allocation4 + $0x348] sm:$0xff] }
  0x5c   :  { %v380_v50 = vld [vmem:[%s1450_s3 + $0x38] sm:$0xff]  ;;  %v410_v61 = vld [vmem:[#allocation4 + $0xe8] sm:$0xff]  ;;  %v393_v63 = vld [vmem:[#allocation4 + $0x60] sm:$0xff] }
  0x5d   :  { %1076 = vmatpush3.bf16.msra.mxu1 %v1075_v42  ;;  %v406_v42 = vld [vmem:[#allocation4 + $0xc8] sm:$0xff]  ;;  %v408_v52 = vld [vmem:[#allocation4 + $0xd8] sm:$0xff]  ;;  %v487_v3 = vld [vmem:[#allocation4 + $0x350] sm:$0xff] }
  0x5e   :  { %1168 = vmatpush3.bf16.msra.mxu0 %v1167_v45  ;;  %1078 = vmatprep.subr.bf16.mxu1 %v1077_v46  ;;  %v390_v45 = vld [vmem:[#allocation4 + $0x48] sm:$0xff]  ;;  %v1220_v46 = vpack.c.bf16 %v482_v40, %v481_v39  ;;  %v1133_v47 = vpack.c.bf16 %v406_v42, %v405_v41  ;;  %v1137_v56 = vpack.c.bf16 %v408_v52, %v407_v51  ;;  %v412_v6 = vld [vmem:[#allocation4 + $0xf8] sm:$0xff]  ;;  %v395_v8 = vld [vmem:[#allocation4 + $0x70] sm:$0xff] }
  0x5f   :  { %1170 = vmatprep.subr.bf16.mxu0 %v1169_v48  ;;  %v483_v48 = vld [vmem:[#allocation4 + $0x330] sm:$0xff]  ;;  %v1135_v53 = vpack.c.bf16 %v390_v45, %v389_v44  ;;  %v396_v11 = vld [vmem:[#allocation4 + $0x78] sm:$0xff]  ;;  %v461_v14 = vld [vmem:[#allocation4 + $0x280] sm:$0xff] }
  0x60   :  { %v1223_v55 = vpack.c.bf16 %v484_v49, %v483_v48  ;;  %v445_v17 = vld [vmem:[#allocation4 + $0x200] sm:$0xff]  ;;  %v446_v20 = vld [vmem:[#allocation4 + $0x208] sm:$0xff]  ;;  %v491_v21 = vld [vmem:[#allocation4 + $0x370] sm:$0xff] }
  0x61   :  { %1080 = vmatpush3.bf16.msra.mxu1 %v1079_v54  ;;  %v391_v54 = vld [vmem:[#allocation4 + $0x50] sm:$0xff]  ;;  %v464_v24 = vld [vmem:[#allocation4 + $0x298] sm:$0xff]  ;;  %v493_v32 = vld [vmem:[#allocation4 + $0x380] sm:$0xff] }
  0x62   :  { %1172 = vmatpush3.bf16.msra.mxu0 %v1171_v57  ;;  %1082 = vmatprep.subr.bf16.mxu1 %v1081_v58  ;;  %v392_v57 = vld [vmem:[#allocation4 + $0x58] sm:$0xff]  ;;  %v485_v58 = vld [vmem:[#allocation4 + $0x340] sm:$0xff]  ;;  %v494_v33 = vld [vmem:[#allocation4 + $0x388] sm:$0xff] }
  0x63   :  { %1174 = vmatprep.subr.bf16.mxu0 %v1173_v60  ;;  %v409_v60 = vld [vmem:[#allocation4 + $0xe0] sm:$0xff]  ;;  %v1139_v62 = vpack.c.bf16 %v392_v57, %v391_v54  ;;  %v1226_v0 = vpack.c.bf16 %v486_v59, %v485_v58  ;;  %v448_v31 = vld [vmem:[#allocation4 + $0x218] sm:$0xff]  ;;  %v466_v35 = vld [vmem:[#allocation4 + $0x2a8] sm:$0xff]  ;;  %v1238_v39 = vpack.c.bf16 %v494_v33, %v493_v32 }
  0x64   :  { %v1141_v1 = vpack.c.bf16 %v410_v61, %v409_v60  ;;  %v449_v38 = vld [vmem:[#allocation4 + $0x220] sm:$0xff]  ;;  %v450_v41 = vld [vmem:[#allocation4 + $0x228] sm:$0xff]  ;;  %v495_v42 = vld [vmem:[#allocation4 + $0x390] sm:$0xff] }
  0x65   :  { %1084 = vmatpush3.bf16.msra.mxu1 %v1083_v2  ;;  %v394_v2 = vld [vmem:[#allocation4 + $0x68] sm:$0xff]  ;;  %v467_v44 = vld [vmem:[#allocation4 + $0x2b0] sm:$0xff]  ;;  %v468_v45 = vld [vmem:[#allocation4 + $0x2b8] sm:$0xff] }
  0x66   :  { %1176 = vmatpush3.bf16.msra.mxu0 %v1175_v4  ;;  %1118 = vmatprep.subr.bf16.mxu1 %v1117_v5  ;;  %v488_v4 = vld [vmem:[#allocation4 + $0x358] sm:$0xff]  ;;  %v411_v5 = vld [vmem:[#allocation4 + $0xf0] sm:$0xff]  ;;  %v1193_v49 = vpack.c.bf16 %v468_v45, %v467_v44  ;;  %v497_v51 = vld [vmem:[#allocation4 + $0x3a0] sm:$0xff] }
  0x67   :  { %1178 = vmatprep.subr.bf16.mxu0 %v1177_v7  ;;  %v1143_v7 = vpack.c.bf16 %v394_v2, %v393_v63  ;;  %v1229_v9 = vpack.c.bf16 %v488_v4, %v487_v3  ;;  %v1145_v10 = vpack.c.bf16 %v412_v6, %v411_v5  ;;  %v498_v52 = vld [vmem:[#allocation4 + $0x3a8] sm:$0xff]  ;;  %v499_v60 = vld [vmem:[#allocation4 + $0x3b0] sm:$0xff]  ;;  %v500_v61 = vld [vmem:[#allocation4 + $0x3b8] sm:$0xff] }
  0x68   :  { %297 = vmatmul.mubr.f32.vlgmr.msra.gmra.mrb[2].mxu1 %v55_v12  ;;  %v489_v12 = vld [vmem:[#allocation4 + $0x360] sm:$0xff]  ;;  %v470_v54 = vld [vmem:[#allocation4 + $0x2c8] sm:$0xff]  ;;  %v1244_v57 = vpack.c.bf16 %v498_v52, %v497_v51  ;;  %v472_v63 = vld [vmem:[#allocation4 + $0x2d8] sm:$0xff]  ;;  %v1247_v2 = vpack.c.bf16 %v500_v61, %v499_v60 }
  0x69   :  { %1120 = vmatpush3.bf16.msra.mxu1 %v1119_v13  ;;  %581 = vmatprep.mubr.f32.mxu1 %v374_v22  ;;  %v490_v13 = vld [vmem:[#allocation4 + $0x368] sm:$0xff]  ;;  %v492_v22 = vld [vmem:[#allocation4 + $0x378] sm:$0xff]  ;;  %v501_v5 = vld [vmem:[#allocation4 + $0x3c0] sm:$0xff] }
  0x6a   :  { %1180 = vmatpush3.bf16.msra.mxu0 %v1179_v15  ;;  %1122 = vmatprep.subr.bf16.mxu1 %v1121_v16  ;;  %v462_v15 = vld [vmem:[#allocation4 + $0x288] sm:$0xff]  ;;  %v1147_v16 = vpack.c.bf16 %v396_v11, %v395_v8  ;;  %v1232_v18 = vpack.c.bf16 %v490_v13, %v489_v12  ;;  %v1235_v28 = vpack.c.bf16 %v492_v22, %v491_v21  ;;  %v456_v4 = vld [vmem:[#allocation4 + $0x258] sm:$0xff]  ;;  %v459_v21 = vld [vmem:[#allocation4 + $0x270] sm:$0xff] }
  0x6b   :  { %1213 = vmatprep.subr.bf16.mxu0 %v1313_v29  ;;  %v1181_v19 = vpack.c.bf16 %v462_v15, %v461_v14  ;;  %v454_v59 = vld [vmem:[#allocation4 + $0x248] sm:$0xff]  ;;  %v503_v14 = vld [vmem:[#allocation4 + $0x3d0] sm:$0xff]  ;;  %v504_v15 = vld [vmem:[#allocation4 + $0x3d8] sm:$0xff] }
  0x6c   :  { %v502_v6 = vld [vmem:[#allocation4 + $0x3c8] sm:$0xff]  ;;  %v460_v22 = vld [vmem:[#allocation4 + $0x278] sm:$0xff]  ;;  %v809_v45 = vld [vmem:[%s1452_s5] ss:$0 sm:$0xff] }
  0x6d   :  { %652 = vmatmul.mubr.f32.vlgmr.msra.gmra.mrb[2].mxu0 %v375_v25  ;;  %1124 = vmatpush3.bf16.msra.mxu1 %v1123_v23  ;;  %v463_v23 = vld [vmem:[#allocation4 + $0x290] sm:$0xff]  ;;  %v373_v25 = vld [vmem:[%s1450_s3] sm:$0xff]  ;;  %v474_v8 = vld [vmem:[#allocation4 + $0x2e8] sm:$0xff]  ;;  %v1250_v11 = vpack.c.bf16 %v502_v6, %v501_v5 }
  0x6e   :  { %1215 = vmatpush1.bf16.msra.mxu0 %v1214_v26  ;;  %1126 = vmatprep.subr.bf16.mxu1 %v1125_v27  ;;  %v1183_v26 = vpack.c.bf16 %v446_v20, %v445_v17  ;;  %v447_v27 = vld [vmem:[#allocation4 + $0x210] sm:$0xff]  ;;  %v1185_v30 = vpack.c.bf16 %v464_v24, %v463_v23  ;;  %v458_v13 = vld [vmem:[#allocation4 + $0x268] sm:$0xff]  ;;  %v476_v17 = vld [vmem:[#allocation4 + $0x2f8] sm:$0xff]  ;;  %v1211_v23 = vpack.c.bf16 %v460_v22, %v459_v21  ;;  %v1314_v24 = vmov 0.0  }
  0x6f   :  { %1216 = vmatprep.subr.bf16.mxu0 %v1313_v29  ;;  %810 = vmatprep.mubr.msk.f32.mxu0 %vm513_vm0, %v380_v50  ;;  %v452_v50 = vld [vmem:[#allocation4 + $0x238] sm:$0xff] }
  0x71   :  { %1128 = vmatpush3.bf16.msra.mxu1 %v1127_v34  ;;  %v465_v34 = vld [vmem:[#allocation4 + $0x2a0] sm:$0xff] }
  0x72   :  { %1218 = vmatpush1.bf16.msra.mxu0 %v1217_v36  ;;  %1130 = vmatprep.subr.bf16.mxu1 %v1129_v37  ;;  %v378_v36 = vld [vmem:[%s1450_s3 + $0x28] sm:$0xff]  ;;  %v1187_v37 = vpack.c.bf16 %v448_v31, %v447_v27  ;;  %v1189_v40 = vpack.c.bf16 %v466_v35, %v465_v34  ;;  %v377_v27 = vld [vmem:[%s1450_s3 + $0x20] sm:$0xff] }
  0x73   :  { %1219 = vmatprep.subr.bf16.mxu0 %v1313_v29  ;;  %v808_v34 = vld [vmem:[%s1449_s2] ss:$0 sm:$0xff] }
  0x75   :  { %1132 = vmatpush3.bf16.msra.mxu1 %v1131_v43  ;;  %v496_v43 = vld [vmem:[#allocation4 + $0x398] sm:$0xff] }
  0x76   :  { %1221 = vmatpush1.bf16.msra.mxu0 %v1220_v46  ;;  %1134 = vmatprep.subr.bf16.mxu1 %v1133_v47  ;;  %v1191_v46 = vpack.c.bf16 %v450_v41, %v449_v38  ;;  %v451_v47 = vld [vmem:[#allocation4 + $0x230] sm:$0xff]  ;;  %v1241_v48 = vpack.c.bf16 %v496_v43, %v495_v42 }
  0x77   :  { %1222 = vmatprep.subr.bf16.mxu0 %v1313_v29 }
  0x79   :  { %1136 = vmatpush3.bf16.msra.mxu1 %v1135_v53  ;;  %v469_v53 = vld [vmem:[#allocation4 + $0x2c0] sm:$0xff] }
  0x7a   :  { %1224 = vmatpush1.bf16.msra.mxu0 %v1223_v55  ;;  %1138 = vmatprep.subr.bf16.mxu1 %v1137_v56  ;;  %v1195_v55 = vpack.c.bf16 %v452_v50, %v451_v47  ;;  %v453_v56 = vld [vmem:[#allocation4 + $0x240] sm:$0xff]  ;;  %v1197_v58 = vpack.c.bf16 %v470_v54, %v469_v53 }
  0x7b   :  { %1225 = vmatprep.subr.bf16.mxu0 %v1313_v29 }
  0x7d   :  { %1140 = vmatpush3.bf16.msra.mxu1 %v1139_v62  ;;  %v471_v62 = vld [vmem:[#allocation4 + $0x2d0] sm:$0xff] }
  0x7e   :  { %1227 = vmatpush1.bf16.msra.mxu0 %v1226_v0  ;;  %1142 = vmatprep.subr.bf16.mxu1 %v1141_v1  ;;  %v1199_v0 = vpack.c.bf16 %v454_v59, %v453_v56  ;;  %v455_v1 = vld [vmem:[#allocation4 + $0x250] sm:$0xff]  ;;  %v1201_v3 = vpack.c.bf16 %v472_v63, %v471_v62 }
  0x7f   :  { %1228 = vmatprep.subr.bf16.mxu0 %v1313_v29 }
  0x81   :  { %1144 = vmatpush3.bf16.msra.mxu1 %v1143_v7  ;;  %v473_v7 = vld [vmem:[#allocation4 + $0x2e0] sm:$0xff] }
  0x82   :  { %1230 = vmatpush1.bf16.msra.mxu0 %v1229_v9  ;;  %1146 = vmatprep.subr.bf16.mxu1 %v1145_v10  ;;  %v1203_v9 = vpack.c.bf16 %v456_v4, %v455_v1  ;;  %v457_v10 = vld [vmem:[#allocation4 + $0x260] sm:$0xff]  ;;  %v1205_v12 = vpack.c.bf16 %v474_v8, %v473_v7 }
  0x83   :  { %1231 = vmatprep.subr.bf16.mxu0 %v1313_v29 }
  0x85   :  { %1148 = vmatpush3.bf16.msra.mxu1 %v1147_v16  ;;  %v475_v16 = vld [vmem:[#allocation4 + $0x2f0] sm:$0xff] }
  0x86   :  { %1233 = vmatpush1.bf16.msra.mxu0 %v1232_v18  ;;  %1182 = vmatprep.subr.bf16.mxu1 %v1181_v19  ;;  %v1207_v18 = vpack.c.bf16 %v458_v13, %v457_v10  ;;  %v1253_v19 = vpack.c.bf16 %v504_v15, %v503_v14  ;;  %v1209_v20 = vpack.c.bf16 %v476_v17, %v475_v16 }
  0x87   :  { %1234 = vmatprep.subr.bf16.mxu0 %v1313_v29 }
  0x88   :  { %582 = vmatmul.mubr.f32.vlgmr.msra.gmra.mrb[4].mxu1 %v373_v25  ;;  %v505_v25 = vld [vmem:[#allocation4 + $0x3e0] sm:$0xff] }
  0x89   :  { %1184 = vmatpush3.bf16.msra.mxu1 %v1183_v26  ;;  %721 = vmatprep.mubr.f32.mxu1 %v378_v36  ;;  %v379_v26 = vld [vmem:[%s1450_s3 + $0x30] sm:$0xff] }
  0x8a   :  { %1236 = vmatpush1.bf16.msra.mxu0 %v1235_v28  ;;  %1186 = vmatprep.subr.bf16.mxu1 %v1185_v30 }
  0x8b   :  { %1237 = vmatprep.subr.bf16.mxu0 %v1313_v29 }
  0x8d   :  { %1188 = vmatpush3.bf16.msra.mxu1 %v1187_v37 }
  0x8e   :  { %1239 = vmatpush1.bf16.msra.mxu0 %v1238_v39  ;;  %1190 = vmatprep.subr.bf16.mxu1 %v1189_v40 }
  0x8f   :  { %1240 = vmatprep.subr.bf16.mxu0 %v1313_v29 }
  0x91   :  { %1192 = vmatpush3.bf16.msra.mxu1 %v1191_v46 }
  0x92   :  { %1242 = vmatpush1.bf16.msra.mxu0 %v1241_v48  ;;  %1194 = vmatprep.subr.bf16.mxu1 %v1193_v49 }
  0x93   :  { %1243 = vmatprep.subr.bf16.mxu0 %v1313_v29 }
  0x95   :  { %1196 = vmatpush3.bf16.msra.mxu1 %v1195_v55 }
  0x96   :  { %1245 = vmatpush1.bf16.msra.mxu0 %v1244_v57  ;;  %1198 = vmatprep.subr.bf16.mxu1 %v1197_v58 }
  0x97   :  { %1246 = vmatprep.subr.bf16.mxu0 %v1313_v29 }
  0x99   :  { %1200 = vmatpush3.bf16.msra.mxu1 %v1199_v0 }
  0x9a   :  { %1248 = vmatpush1.bf16.msra.mxu0 %v1247_v2  ;;  %1202 = vmatprep.subr.bf16.mxu1 %v1201_v3 }
  0x9b   :  { %1249 = vmatprep.subr.bf16.mxu0 %v1313_v29 }
  0x9d   :  { %1204 = vmatpush3.bf16.msra.mxu1 %v1203_v9 }
  0x9e   :  { %1251 = vmatpush1.bf16.msra.mxu0 %v1250_v11  ;;  %1206 = vmatprep.subr.bf16.mxu1 %v1205_v12 }
  0x9f   :  { %1252 = vmatprep.subr.bf16.mxu0 %v1313_v29 }
  0xa1   :  { %1208 = vmatpush3.bf16.msra.mxu1 %v1207_v18 }
  0xa2   :  { %1254 = vmatpush1.bf16.msra.mxu0 %v1253_v19  ;;  %1210 = vmatprep.subr.bf16.mxu1 %v1209_v20 }
  0xa3   :  { %783 = vmatprep.subr.mxu0 %v1314_v24 }
  0xa5   :  { %1212 = vmatpush3.bf16.msra.mxu1 %v1211_v23 }
  0xa6   :  { %784 = vmatpush1.msra.mxu0 %v505_v25 }
  0xa7   :  { %792 = vmatmul.mubr.f32.vlgmr.msra.gmra.mrb[4].mxu0 %v379_v26 }
  0xa8   :  { %722 = vmatmul.mubr.f32.vlgmr.msra.gmra.mrb[6].mxu1 %v377_v27 }
 0x11b   :  { %v843_v29 = vpop.f32.mrb[0].mxu1 }
 0x11c   :  { %v844_v28 = vpop.f32.mrb[1].mxu1 }
 0x11d   :  { %v845_v30 = vadd.f32 %v844_v28, %v843_v29 }
 0x11f   :  { %v229_v37 = vadd.f32 %v845_v30, %v808_v34 }
 0x120   :  { %v913_v31 = vpop.f32.mrb[0].mxu0 }
 0x121   :  { %v914_v32 = vpop.f32.mrb[1].mxu0 }
 0x122   :  { %v915_v33 = vadd.f32 %v914_v32, %v913_v31 }
 0x13b   :  { %v878_v35 = vpop.f32.mrb[2].mxu1 }
 0x13c   :  { %v879_v36 = vpop.f32.mrb[3].mxu1 }
 0x13d   :  { %v880_v38 = vadd.f32 %v879_v36, %v878_v35 }
 0x13f   :  { %v299_v39 = vadd.f32 %v880_v38, %v229_v37 }
 0x140   :  { %v983_v40 = vpop.f32.mrb[2].mxu0 }
 0x141   :  { %v984_v41 = vpop.f32.mrb[3].mxu0  ;;  %v369_v42 = vadd.f32 %v915_v33, %v299_v39 }
 0x142   :  { %v985_v43 = vadd.f32 %v984_v41, %v983_v40 }
 0x143   :  { %372 = vst [vmem:[%s1453_s6] sm:$0xff] %v369_v42 }
 0x15b   :  { %v948_v44 = vpop.f32.mrb[4].mxu1 }
 0x15c   :  { %v949_v46 = vpop.f32.mrb[5].mxu1 }
 0x15d   :  { %v950_v47 = vadd.f32 %v949_v46, %v948_v44 }
 0x15f   :  { %v584_v48 = vadd.f32 %v950_v47, %v809_v45 }
 0x161   :  { %v654_v49 = vadd.f32 %v985_v43, %v584_v48 }
 0x17a   :  { %v793_v50 = vpop.f32.mrb[4].mxu0 }
 0x17b   :  { %v795_v51 = vpop.f32.mrb[5].mxu0  ;;  %v1018_v52 = vpop.f32.mrb[6].mxu1 }
 0x17c   :  { %v1019_v53 = vpop.f32.mrb[7].mxu1 }
 0x17d   :  { %v1020_v54 = vadd.f32 %v1019_v53, %v1018_v52 }
 0x17f   :  { %v724_v55 = vadd.f32 %v1020_v54, %v654_v49 }
 0x181   :  { %v794_v56 = vadd.f32 %v793_v50, %v724_v55 }
 0x183   :  { %797 = vst [vmem:[%s1454_s7] sm:$0xff] %v794_v56 }
 0x184   :  { %806 = vsyncpa [#allocation3], 1 }
 0x185   :  { %807 = vsyncpa [#allocation5], 1 }

</bundles_post_ra>
